<compile_context>
chip_gen: v7x
topology: tpu7x:2x2x1
jax: 0.10.0
libtpu: 0.0.40
codegen_flags: <defaults>
</compile_context>

<pallas_src>
import functools

import jax
import jax.numpy as jnp
import numpy as np
from jax import lax
from jax.experimental import pallas as pl
from jax.experimental.pallas import tpu as pltpu

# ---- model hyper-parameters (fixed by the torch module) ----
C_IN, C_OUT = 16, 32
KH, KW = 3, 5
PH, PW = 1, 2          # padding
DH, DW = 2, 1          # dilation
GROUPS = 4
ICG, OCG = C_IN // GROUPS, C_OUT // GROUPS
BN_EPS = 1e-5


def _round_up(x, m):
    return (x + m - 1) // m * m


@functools.lru_cache(maxsize=None)
def _roll_like_jnp() -> bool:
    """One-off probe of pltpu.roll's rotation direction (cached).

    jnp.roll semantics: out[i] = x[i - shift].  Must first be called outside
    jit (this script never jits model_forward).
    """
    def probe(x_ref, o_ref):
        o_ref[...] = pltpu.roll(x_ref[...], 1, axis=1)

    x = jnp.broadcast_to(jnp.arange(128, dtype=jnp.float32), (8, 128))
    out = pl.pallas_call(
        probe, out_shape=jax.ShapeDtypeStruct((8, 128), jnp.float32))(x)
    return bool(np.asarray(out)[0, 1] == 0.0)


# ---------------- Pallas kernel ----------------

def _make_conv_bn_kernel(offsets, lp, roll_is_jnp):
    """Grouped dilated conv with taps formed in VMEM + masked BN partial stats."""

    def kernel(x_ref, w_ref, mask_ref, out_ref, stats_ref):
        # x_ref:     (1, C_IN, lp)        zero-padded image, (H,W) flat on lanes
        # w_ref:     (KH*KW, C_OUT, C_IN) per-tap dense (block-diagonal) weights
        # mask_ref:  (1, lp)              1.0 on valid output lanes, 0.0 elsewhere
        # out_ref:   (1, C_OUT, lp)       lane-dense conv output (NCHW order)
        # stats_ref: (1, C_OUT, 2)        [:,0]=sum, [:,1]=sum of squares (masked)
        x = x_ref[0]
        acc = None
        for t, off in enumerate(offsets):
            if off == 0:
                xt = x
            else:
                sh = (lp - off) if roll_is_jnp else off
                xt = pltpu.roll(x, sh, axis=1)        # xt[:, i] = x[:, i + off]
            part = jnp.dot(w_ref[t], xt, preferred_element_type=jnp.float32)
            acc = part if acc is None else acc + part
        out_ref[0] = acc

        accm = acc * mask_ref[...]                    # zero out invalid lanes
        stats_ref[0, :, 0:1] = accm.sum(axis=1, keepdims=True)
        stats_ref[0, :, 1:2] = (accm * acc).sum(axis=1, keepdims=True)

    return kernel


# ---------------- wrapper ----------------

def model_forward(x_nchw, weight, bias, gamma, beta):
    # BN training mode subtracts the batch mean -> the conv bias cancels exactly.
    del bias
    N, _, H, W = x_nchw.shape
    hp, wp = H + 2 * PH, W + 2 * PW
    h_out = hp - DH * (KH - 1)
    w_out = wp - DW * (KW - 1)
    lp = _round_up(hp * wp, 128)

    # glue: zero-pad and flatten (H, W) onto the lane axis (~1.2x the raw input,
    # replacing the 15-16x im2col expansion of the previous version).
    x = x_nchw.astype(jnp.float32)
    x_pad = jnp.pad(x, ((0, 0), (0, 0), (PH, PH), (PW, PW)))
    x_flat = jnp.pad(x_pad.reshape(N, C_IN, hp * wp),
                     ((0, 0), (0, 0), (0, lp - hp * wp)))

    # glue: grouped weights -> dense per-tap (C_OUT, C_IN) matrices (zeros off-group).
    w_full = jnp.zeros((C_OUT, C_IN, KH, KW), jnp.float32)
    for g in range(GROUPS):
        w_full = w_full.at[g * OCG:(g + 1) * OCG,
                           g * ICG:(g + 1) * ICG].set(
            weight[g * OCG:(g + 1) * OCG].astype(jnp.float32))
    w_taps = jnp.transpose(w_full, (2, 3, 0, 1)).reshape(KH * KW, C_OUT, C_IN)

    # flat-lane offsets of the 15 dilated taps + valid-output lane mask.
    offsets = tuple(kh * DH * wp + kw * DW for kh in range(KH) for kw in range(KW))
    ii = np.arange(lp)
    mask = jnp.asarray(
        ((ii < h_out * wp) & (ii % wp < w_out)).astype(np.float32)).reshape(1, lp)

    conv_out, stats = pl.pallas_call(
        _make_conv_bn_kernel(offsets, lp, _roll_like_jnp()),
        out_shape=(
            jax.ShapeDtypeStruct((N, C_OUT, lp), jnp.float32),
            jax.ShapeDtypeStruct((N, C_OUT, 2), jnp.float32),
        ),
        grid=(N,),
        in_specs=[
            pl.BlockSpec((1, C_IN, lp), lambda b: (b, 0, 0)),
            pl.BlockSpec((KH * KW, C_OUT, C_IN), lambda b: (0, 0, 0)),
            pl.BlockSpec((1, lp), lambda b: (0, 0)),
        ],
        out_specs=[
            pl.BlockSpec((1, C_OUT, lp), lambda b: (b, 0, 0)),
            pl.BlockSpec((1, C_OUT, 2), lambda b: (b, 0, 0)),
        ],
        compiler_params=pltpu.CompilerParams(
            dimension_semantics=("parallel",)),
    )(x_flat, w_taps, mask)
    # TODO(synk): for very large images (VMEM pressure) or N == 1 on v7x, split
    # the lane axis into output-row strips with a DH*(KH-1)-row halo instead of
    # one whole image per grid step.

    # glue: finish BN in plain JAX (32-element math + one fused FMA over the output).
    count = float(N * h_out * w_out)
    ch_sum = stats[:, :, 0].sum(axis=0)
    ch_sq = stats[:, :, 1].sum(axis=0)
    mean = ch_sum / count
    var = ch_sq / count - mean * mean          # biased variance (torch BN training mode)
    inv_std = lax.rsqrt(var + BN_EPS)
    bn_scale = gamma.astype(jnp.float32) * inv_std
    bn_shift = beta.astype(jnp.float32) - mean * bn_scale

    y = conv_out[:, :, :h_out * wp].reshape(N, C_OUT, h_out, wp)[:, :, :, :w_out]
    return y * bn_scale[None, :, None, None] + bn_shift[None, :, None, None]


# ---------------- pure-JAX reference (for correctness check) ----------------

def reference_forward(x, weight, bias, gamma, beta):
    conv = lax.conv_general_dilated(
        x, weight, window_strides=(1, 1),
        padding=((PH, PH), (PW, PW)),
        rhs_dilation=(DH, DW),
        dimension_numbers=("NCHW", "OIHW", "NCHW"),
        feature_group_count=GROUPS,
        precision=lax.Precision.HIGHEST)
    conv = conv + bias.reshape(1, C_OUT, 1, 1)
    mean = conv.mean(axis=(0, 2, 3), keepdims=True)
    var = ((conv - mean) ** 2).mean(axis=(0, 2, 3), keepdims=True)
    return ((conv - mean) / jnp.sqrt(var + BN_EPS)) * gamma.reshape(1, C_OUT, 1, 1) \
        + beta.reshape(1, C_OUT, 1, 1)


if __name__ == "__main__":
    key = jax.random.PRNGKey(0)
    kx, kw, kb = jax.random.split(key, 3)

    # small shapes consistent with the module (C_in fixed at 16 by the conv)
    N, H, W = 2, 12, 16
    x = jax.random.normal(kx, (N, C_IN, H, W), jnp.float32)

    # deterministic parameter init (PyTorch-like uniform range)
    fan_in = ICG * KH * KW
    bound = 1.0 / (fan_in ** 0.5)
    weight = jax.random.uniform(kw, (C_OUT, ICG, KH, KW), jnp.float32, -bound, bound)
    bias = jax.random.uniform(kb, (C_OUT,), jnp.float32, -bound, bound)
    gamma = jnp.ones((C_OUT,), jnp.float32)   # BatchNorm2d affine init
    beta = jnp.zeros((C_OUT,), jnp.float32)

    out = jax.block_until_ready(model_forward(x, weight, bias, gamma, beta))

    expected_shape = (N, C_OUT, H + 2 * PH - DH * (KH - 1), W + 2 * PW - DW * (KW - 1))
    assert out.shape == expected_shape, (out.shape, expected_shape)

    ref = reference_forward(x, weight, bias, gamma, beta)
    np.testing.assert_allclose(np.asarray(out), np.asarray(ref), rtol=2e-3, atol=2e-3)

    print("KERNEL_OK")
</pallas_src>

<mosaic_0001>
module attributes {stable_mosaic.version = 11 : i64} {
  func.func @probe(%arg0: memref<8x128xf32, #tpu.memory_space<vmem>>, %arg1: memref<8x128xf32, #tpu.memory_space<vmem>>) attributes {dimension_semantics = [], scalar_prefetch = 0 : i64, scratch_operands = 0 : i64, tpu.core_type = #tpu.core_type<tc>} {
    %c0 = arith.constant 0 : index
    %c0_0 = arith.constant 0 : index
    %0 = vector.load %arg0[%c0, %c0_0] : memref<8x128xf32, #tpu.memory_space<vmem>>, vector<8x128xf32>
    %c1_i32 = arith.constant 1 : i32
    %1 = tpu.dynamic_rotate %0 by %c1_i32 dim 1 : vector<8x128xf32>, i32 -> vector<8x128xf32>
    %c0_1 = arith.constant 0 : index
    %c0_2 = arith.constant 0 : index
    %2 = vector.load %arg1[%c0_1, %c0_2] : memref<8x128xf32, #tpu.memory_space<vmem>>, vector<8x128xf32>
    tpu.vector_store %arg1[%c0_1, %c0_2], %1 {strides = array<i32>} : memref<8x128xf32, #tpu.memory_space<vmem>>, vector<8x128xf32>,
    return
  }
}

</mosaic_0001>

<bundles_post_ra>
// kernel: tpu_custom_call.1
= control target key start
LH: loop header
LB: loop body
LE: loop exit
PB: predicated region body
PF: predicated region fallthrough
CT: control target
= control target key end

     0   :  { %6 = vsyncpa [#allocation3], 0  ;;  %s128_s0 = inlined_call_operand.hbm [shape: f32[8,128], index: 0, kind: input, shape index: {}]   ;;  %s129_s1 = inlined_call_operand.hbm [shape: f32[8,128], index: 1, kind: output, shape index: {}]  }
   0x1   :  { %7 = vsyncpa [#allocation4], 0  ;;  %s91_s6 = smov [#allocation2]   ;;  %s43_s10 = scalar_lea.hbm %s128_s0, 128 }
   0x2   :  { %s14_s7 = sshll.u32 %s91_s6, 4  ;;  %p44_p0 = scmp.ne.s32.totalorder %s128_s0, %s43_s10  ;;  %s15_s7 = int_to_ptr.vmem [resolvable:$true] %s14_s7 }
   0x3   :  { %p47_p1 = scmp.lt.u32.totalorder %s43_s10, %s128_s0 }
   0x5   :  { %p49_p2 = pnand %p47_p1, %p44_p0 }
   0x7   :  { %52 = shalt.err (!%p49_p2)
}
   0x8   :  { %s53_s15 = scalar_lea.vmem %s15_s7, 128  ;;  %p58_p4 = scmp.lt.s32.totalorder %s15_s7, %s15_s7 }
   0x9   :  { %p54_p3 = scmp.ne.s32.totalorder %s15_s7, %s53_s15  ;;  %p59_p5 = scmp.lt.s32.totalorder %s53_s15, %s53_s15 }
   0xb   :  { %p60_p6 = por %p59_p5, %p58_p4 }
   0xd   :  { %p61_p7 = pnand %p60_p6, %p54_p3 }
   0xf   :  { %64 = shalt.err (!%p61_p7)
}
  0x10   :  { %17 = dma.hbm_to_vmem [thread:$0]  %s128_s0, 128, %s15_s7, [#allocation3]  }
  0x11   :  { %87 = dma.done.wait [#allocation3], 128  }
  0x12   :  { %88 = vsyncadd [#allocation3], 4294967168  ;;  %v21_v0 = vld [vmem:[#allocation2] sm:$0xff]  ;;  %s92_s18 = smov 1   ;;  %s93_s19 = smov [#allocation5]  }
  0x13   :  { %22 = vrot.lane.b32.xlu0 %v21_v0, %s92_s18  ;;  %s31_s20 = sshll.u32 %s93_s19, 4  ;;  %s32_s20 = int_to_ptr.vmem [resolvable:$true] %s31_s20 }
  0x14   :  { %s65_s21 = scalar_lea.vmem %s32_s20, 128  ;;  %p70_p9 = scmp.lt.s32.totalorder %s32_s20, %s32_s20 }
  0x15   :  { %p66_p8 = scmp.ne.s32.totalorder %s32_s20, %s65_s21  ;;  %p71_p10 = scmp.lt.s32.totalorder %s65_s21, %s65_s21 }
  0x17   :  { %p72_p11 = por %p71_p10, %p70_p9 }
  0x19   :  { %p73_p12 = pnand %p72_p11, %p66_p8 }
  0x85   :  { %v23_v1 = vpop.permute.xlu0 %22 }
  0x86   :  { %24 = vst [vmem:[#allocation5] sm:$0xff] %v23_v1 }
  0x87   :  { %76 = shalt.err (!%p73_p12)
}
  0x88   :  { %s77_s0 = scalar_lea.hbm %s129_s1, 128 }
  0x89   :  { %p78_p13 = scmp.ne.s32.totalorder %s129_s1, %s77_s0  ;;  %p81_p0 = scmp.lt.u32.totalorder %s77_s0, %s129_s1 }
  0x8b   :  { %p83_p1 = pnand %p81_p0, %p78_p13 }
  0x8d   :  { %86 = shalt.err (!%p83_p1)
}
  0x8e   :  { %34 = dma.vmem_to_hbm [thread:$0]  %s32_s20, 128, %s129_s1, [#allocation4]  }
  0x8f   :  { %89 = dma.done.wait [#allocation4], 128  }
  0x90   :  { %90 = vsyncadd [#allocation4], 4294967168 }
  0x91   :  { %38 = vsyncpa [#allocation3], 1 }
  0x92   :  { %39 = vsyncpa [#allocation4], 1 }

</bundles_post_ra>
